<compile_context>
chip_gen: v7x
topology: tpu7x:2x2x1
jax: 0.10.0
libtpu: 0.0.40
codegen_flags: <defaults>
</compile_context>

<pallas_src>
import functools

import jax
import jax.numpy as jnp
from jax.experimental import pallas as pl
from jax.experimental.pallas import tpu as pltpu

_LANES = 128
_SUBLANES = 8
_MAX_BLOCK_ROWS = 2048      # 2048 * 128 * 4 B = 1 MiB per input block


def _endpoint_kernel(p_ref, t_ref, out_ref, acc_ref, *, scale):
    """Sum-of-squared-differences over lane-dense row blocks.

    grid = (num_parallel, inner_steps); axis 0 is 'parallel' (per-core
    partials), axis 1 is the 'arbitrary' reduction over row blocks.
    """
    i = pl.program_id(1)

    @pl.when(i == 0)
    def _():
        acc_ref[...] = jnp.zeros_like(acc_ref)

    # Cast only this (endpoint-only, lane-dense) block to f32.
    d = p_ref[...].astype(jnp.float32) - t_ref[...].astype(jnp.float32)
    sq = d * d
    # vreg-wise partial sums over the leading axis: pure VPU adds,
    # no cross-lane / cross-sublane work in the steady state.
    acc_ref[...] += jnp.sum(sq.reshape(-1, _SUBLANES, _LANES), axis=0)

    @pl.when(i == pl.num_programs(1) - 1)
    def _():
        # Single lane-dense (8,128) store per core; scale folded in here.
        out_ref[...] = acc_ref[...] * scale


def endpoint_loss_pallas(pred, target, loss_weight=1.0, *,
                         max_block_rows=_MAX_BLOCK_ROWS):
    assert pred.shape == target.shape, (
        'pred and target should have the same shape, but got '
        f'{pred.shape} and {target.shape}')
    assert max_block_rows % _SUBLANES == 0
    B, N, D = pred.shape

    # Fold loss_weight, the 0.5 average and the MSE normalizer into one scale.
    scale = float(loss_weight) * 0.5 / float(B * D)

    # ---- tiling over the lane-dense endpoint slab --------------------------
    flat_len = 2 * B * D
    rows = -(-flat_len // _LANES)
    rows8 = -(-rows // _SUBLANES) * _SUBLANES          # multiple of 8

    if rows8 <= max_block_rows:
        block_rows = rows8
        num_parallel, inner_steps = 1, 1
    else:
        block_rows = max_block_rows
        num_blocks = -(-rows8 // block_rows)
        num_parallel = 2                               # v7x: one per TensorCore
        inner_steps = -(-num_blocks // num_parallel)

    rows_padded = num_parallel * inner_steps * block_rows
    padded_len = rows_padded * _LANES

    # ---- wrapper-side gather: one slice+concat+reshape(+pad) per input -----
    def lane_dense(x):
        ep = jnp.concatenate([x[:, 0, :], x[:, -1, :]], axis=-1)   # (B, 2D)
        flat = ep.reshape(-1)
        if padded_len != flat_len:                     # zero pad -> diff = 0
            flat = jnp.pad(flat, (0, padded_len - flat_len))
        return flat.reshape(rows_padded, _LANES)

    p2d = lane_dense(pred)
    t2d = lane_dense(target)

    in_map = lambda c, i: (c * inner_steps + i, 0)

    out = pl.pallas_call(
        functools.partial(_endpoint_kernel, scale=scale),
        out_shape=jax.ShapeDtypeStruct((num_parallel * _SUBLANES, _LANES),
                                       jnp.float32),
        grid=(num_parallel, inner_steps),
        in_specs=[
            pl.BlockSpec((block_rows, _LANES), in_map),
            pl.BlockSpec((block_rows, _LANES), in_map),
        ],
        # One lane-dense (8,128) partial per core, written once at the end.
        out_specs=pl.BlockSpec((_SUBLANES, _LANES), lambda c, i: (c, 0)),
        scratch_shapes=[pltpu.VMEM((_SUBLANES, _LANES), jnp.float32)],
        compiler_params=pltpu.CompilerParams(
            dimension_semantics=("parallel", "arbitrary"),
            vmem_limit_bytes=32 * 1024 * 1024,
        ),
    )(p2d, t2d)

    # Sum per-core (and per-lane) partials; zero padding contributed nothing.
    return jnp.sum(out)


def endpoint_loss_ref(pred, target, loss_weight=1.0):
    """Pure-JAX reference mirroring the PyTorch module."""
    p1 = pred[:, 0, :].astype(jnp.float32) - target[:, 0, :].astype(jnp.float32)
    pe = pred[:, -1, :].astype(jnp.float32) - target[:, -1, :].astype(jnp.float32)
    loss_p1 = jnp.mean(p1 * p1)
    loss_pe = jnp.mean(pe * pe)
    return loss_weight * (loss_p1 + loss_pe) * 0.5


if __name__ == "__main__":
    # EndpointLoss has no learnable parameters; loss_weight is a config scalar.
    key = jax.random.PRNGKey(0)
    k1, k2 = jax.random.split(key)

    # 1) Small primary case (single block, grid = (1,1)).
    B, N, D = 2, 8, 2
    pred = jax.random.normal(k1, (B, N, D), dtype=jnp.float32)
    target = jax.random.normal(k2, (B, N, D), dtype=jnp.float32)
    loss = jax.block_until_ready(endpoint_loss_pallas(pred, target, 1.0))
    ref = jax.block_until_ready(endpoint_loss_ref(pred, target, 1.0))
    assert jnp.allclose(loss, ref, rtol=1e-5, atol=1e-6), (loss, ref)

    # 2) Padding path (flat_len not a multiple of 128).
    B1, N1, D1 = 3, 5, 2
    pred1 = jax.random.normal(k1, (B1, N1, D1), dtype=jnp.float32)
    target1 = jax.random.normal(k2, (B1, N1, D1), dtype=jnp.float32)
    loss1 = jax.block_until_ready(endpoint_loss_pallas(pred1, target1, 0.3))
    ref1 = jax.block_until_ready(endpoint_loss_ref(pred1, target1, 0.3))
    assert jnp.allclose(loss1, ref1, rtol=1e-5, atol=1e-6), (loss1, ref1)

    # 3) Multi-block + 2-way parallel + accumulate path: shrink max_block_rows
    #    so grid = (2, 2) is actually exercised (init / accumulate / finalize).
    B2, N2, D2 = 4096, 16, 2
    pred2 = jax.random.normal(k1, (B2, N2, D2), dtype=jnp.float32)
    target2 = jax.random.normal(k2, (B2, N2, D2), dtype=jnp.float32)
    loss2 = jax.block_until_ready(
        endpoint_loss_pallas(pred2, target2, 0.7, max_block_rows=32))
    ref2 = jax.block_until_ready(endpoint_loss_ref(pred2, target2, 0.7))
    assert jnp.allclose(loss2, ref2, rtol=1e-5, atol=1e-6), (loss2, ref2)

    print("KERNEL_OK")
</pallas_src>

<mosaic_0001>
module attributes {stable_mosaic.version = 11 : i64} {
  func.func @_endpoint_kernel(%arg0: i32, %arg1: i32, %arg2: memref<8x128xf32, #tpu.memory_space<vmem>>, %arg3: memref<8x128xf32, #tpu.memory_space<vmem>>, %arg4: memref<8x128xf32, #tpu.memory_space<vmem>>, %arg5: memref<8x128xf32, #tpu.memory_space<vmem>>) attributes {dimension_semantics = [#tpu.dimension_semantics<parallel>, #tpu.dimension_semantics<arbitrary>], iteration_bounds = array<i64: 1, 1>, scalar_prefetch = 0 : i64, scratch_operands = 1 : i64, tpu.core_type = #tpu.core_type<tc>, window_params = [{transform_indices = @transform_0, window_bounds = array<i64: 8, 128>}, {transform_indices = @transform_1, window_bounds = array<i64: 8, 128>}, {transform_indices = @transform_2, window_bounds = array<i64: 8, 128>}]} {
    %c0_i32 = arith.constant 0 : i32
    %0 = arith.cmpi eq, %arg1, %c0_i32 : i32
    %1 = arith.extui %0 : i1 to i32
    %c0_i32_0 = arith.constant 0 : i32
    %2 = arith.cmpi ne, %1, %c0_i32_0 : i32
    scf.if %2 {
      %cst_10 = arith.constant 0.000000e+00 : f32
      %15 = vector.broadcast %cst_10 : f32 to vector<8x128xf32>
      %c0_11 = arith.constant 0 : index
      %c0_12 = arith.constant 0 : index
      %16 = vector.load %arg5[%c0_11, %c0_12] : memref<8x128xf32, #tpu.memory_space<vmem>>, vector<8x128xf32>
      tpu.vector_store %arg5[%c0_11, %c0_12], %15 {strides = array<i32>} : memref<8x128xf32, #tpu.memory_space<vmem>>, vector<8x128xf32>,
    } else {
    }
    %c0 = arith.constant 0 : index
    %c0_1 = arith.constant 0 : index
    %3 = vector.load %arg2[%c0, %c0_1] : memref<8x128xf32, #tpu.memory_space<vmem>>, vector<8x128xf32>
    %c0_2 = arith.constant 0 : index
    %c0_3 = arith.constant 0 : index
    %4 = vector.load %arg3[%c0_2, %c0_3] : memref<8x128xf32, #tpu.memory_space<vmem>>, vector<8x128xf32>
    %5 = arith.subf %3, %4 : vector<8x128xf32>
    %6 = arith.mulf %5, %5 : vector<8x128xf32>
    %c0_4 = arith.constant 0 : index
    %c0_5 = arith.constant 0 : index
    %7 = vector.load %arg5[%c0_4, %c0_5] : memref<8x128xf32, #tpu.memory_space<vmem>>, vector<8x128xf32>
    %8 = vector.shape_cast %6 : vector<8x128xf32> to vector<1x8x128xf32>
    %cst = arith.constant dense<0.000000e+00> : vector<8x128xf32>
    %9 = vector.multi_reduction <add>, %8, %cst [0] : vector<1x8x128xf32> to vector<8x128xf32>
    %10 = arith.addf %7, %9 : vector<8x128xf32>
    %c0_6 = arith.constant 0 : index
    %c0_7 = arith.constant 0 : index
    %11 = vector.load %arg5[%c0_6, %c0_7] : memref<8x128xf32, #tpu.memory_space<vmem>>, vector<8x128xf32>
    tpu.vector_store %arg5[%c0_6, %c0_7], %10 {strides = array<i32>} : memref<8x128xf32, #tpu.memory_space<vmem>>, vector<8x128xf32>,
    %c0_i32_8 = arith.constant 0 : i32
    %12 = arith.cmpi eq, %arg1, %c0_i32_8 : i32
    %13 = arith.extui %12 : i1 to i32
    %c0_i32_9 = arith.constant 0 : i32
    %14 = arith.cmpi ne, %13, %c0_i32_9 : i32
    scf.if %14 {
      %c0_10 = arith.constant 0 : index
      %c0_11 = arith.constant 0 : index
      %15 = vector.load %arg5[%c0_10, %c0_11] : memref<8x128xf32, #tpu.memory_space<vmem>>, vector<8x128xf32>
      %cst_12 = arith.constant 1.250000e-01 : f32
      %16 = vector.broadcast %cst_12 : f32 to vector<8x128xf32>
      %17 = arith.mulf %15, %16 : vector<8x128xf32>
      %c0_13 = arith.constant 0 : index
      %c0_14 = arith.constant 0 : index
      %18 = vector.load %arg4[%c0_13, %c0_14] : memref<8x128xf32, #tpu.memory_space<vmem>>, vector<8x128xf32>
      tpu.vector_store %arg4[%c0_13, %c0_14], %17 {strides = array<i32>} : memref<8x128xf32, #tpu.memory_space<vmem>>, vector<8x128xf32>,
    } else {
    }
    return
  }
  func.func @transform_0(%arg0: i32, %arg1: i32) -> (i32, i32) {
    %c1_i32 = arith.constant 1 : i32
    %0 = arith.muli %arg0, %c1_i32 : i32
    %1 = arith.addi %0, %arg1 : i32
    %c0_i32 = arith.constant 0 : i32
    %c0_i32_0 = arith.constant 0 : i32
    return %1, %c0_i32 : i32, i32
  }
  func.func @transform_1(%arg0: i32, %arg1: i32) -> (i32, i32) {
    %c1_i32 = arith.constant 1 : i32
    %0 = arith.muli %arg0, %c1_i32 : i32
    %1 = arith.addi %0, %arg1 : i32
    %c0_i32 = arith.constant 0 : i32
    %c0_i32_0 = arith.constant 0 : i32
    return %1, %c0_i32 : i32, i32
  }
  func.func @transform_2(%arg0: i32, %arg1: i32) -> (i32, i32) {
    %c0_i32 = arith.constant 0 : i32
    %c0_i32_0 = arith.constant 0 : i32
    return %arg0, %c0_i32 : i32, i32
  }
}

</mosaic_0001>

<bundles_post_ra>
// kernel: tpu_custom_call.1
= control target key start
LH: loop header
LB: loop body
LE: loop exit
PB: predicated region body
PF: predicated region fallthrough
CT: control target
= control target key end

     0   :  { %7 = vsyncpa [#allocation4], 0  ;;  %s208_s0 = inlined_call_operand.hbm [shape: f32[8,128], index: 0, kind: input, shape index: {}]   ;;  %s209_s1 = inlined_call_operand.hbm [shape: f32[8,128], index: 1, kind: input, shape index: {}]   ;;  %s210_s2 = inlined_call_operand.hbm [shape: f32[8,128], index: 2, kind: output, shape index: {}]  }
   0x1   :  { %8 = vsyncpa [#allocation7], 0 }
   0x2   :  { %9 = vsyncpa [#allocation5], 0  ;;  %s154_s9 = smov [#allocation3]   ;;  %s155_s11 = smov [#allocation6]  }
   0x3   :  { %s19_s10 = sshll.u32 %s154_s9, 4  ;;  %s32_s12 = sshll.u32 %s155_s11, 4  ;;  %s20_s10 = int_to_ptr.vmem [resolvable:$true] %s19_s10  ;;  %s33_s12 = int_to_ptr.vmem [resolvable:$true] %s32_s12 }
   0x4   :  { %s82_s15 = scalar_lea.hbm %s208_s0, 128 }
   0x5   :  { %p83_p0 = scmp.ne.s32.totalorder %s208_s0, %s82_s15  ;;  %p86_p1 = scmp.lt.u32.totalorder %s82_s15, %s208_s0 }
   0x7   :  { %p88_p2 = pnand %p86_p1, %p83_p0 }
   0x9   :  { %91 = shalt.err (!%p88_p2)
}
   0xa   :  { %s92_s20 = scalar_lea.vmem %s20_s10, 128  ;;  %p97_p4 = scmp.lt.s32.totalorder %s20_s10, %s20_s10 }
   0xb   :  { %p93_p3 = scmp.ne.s32.totalorder %s20_s10, %s92_s20  ;;  %p98_p5 = scmp.lt.s32.totalorder %s92_s20, %s92_s20 }
   0xd   :  { %p99_p6 = por %p98_p5, %p97_p4 }
   0xf   :  { %p100_p7 = pnand %p99_p6, %p93_p3 }
  0x11   :  { %103 = shalt.err (!%p100_p7)
}
  0x12   :  { %22 = dma.hbm_to_vmem [thread:$0]  %s208_s0, 128, %s20_s10, [#allocation4]  }
  0x13   :  { %s104_s25 = scalar_lea.hbm %s209_s1, 128 }
  0x14   :  { %p105_p8 = scmp.ne.s32.totalorder %s209_s1, %s104_s25  ;;  %p108_p9 = scmp.lt.u32.totalorder %s104_s25, %s209_s1 }
  0x16   :  { %p110_p10 = pnand %p108_p9, %p105_p8 }
  0x18   :  { %113 = shalt.err (!%p110_p10)
}
  0x19   :  { %s114_s30 = scalar_lea.vmem %s33_s12, 128  ;;  %p119_p12 = scmp.lt.s32.totalorder %s33_s12, %s33_s12 }
  0x1a   :  { %p115_p11 = scmp.ne.s32.totalorder %s33_s12, %s114_s30  ;;  %p120_p13 = scmp.lt.s32.totalorder %s114_s30, %s114_s30 }
  0x1c   :  { %p121_p0 = por %p120_p13, %p119_p12 }
  0x1e   :  { %p122_p1 = pnand %p121_p0, %p115_p11 }
  0x20   :  { %125 = shalt.err (!%p122_p1)
}
  0x21   :  { %35 = dma.hbm_to_vmem [thread:$0]  %s209_s1, 128, %s33_s12, [#allocation7]  }
  0x22   :  { %148 = dma.done.wait [#allocation4], 128  }
  0x23   :  { %149 = vsyncadd [#allocation4], 4294967168 }
  0x24   :  { %150 = dma.done.wait [#allocation7], 128  }
  0x25   :  { %151 = vsyncadd [#allocation7], 4294967168  ;;  %v49_v0 = vld [vmem:[#allocation3] sm:$0xff]  ;;  %v50_v1 = vld [vmem:[#allocation6] sm:$0xff]  ;;  %s156_s4 = smov [#allocation8]  }
  0x26   :  { %v51_v2 = vsub.f32 %v49_v0, %v50_v1  ;;  %s69_s5 = sshll.u32 %s156_s4, 4  ;;  %s70_s5 = int_to_ptr.vmem [resolvable:$true] %s69_s5 }
  0x27   :  { %s126_s6 = scalar_lea.vmem %s70_s5, 128  ;;  %p131_p3 = scmp.lt.s32.totalorder %s70_s5, %s70_s5 }
  0x28   :  { %v52_v3 = vmul.f32 %v51_v2, %v51_v2  ;;  %p127_p2 = scmp.ne.s32.totalorder %s70_s5, %s126_s6  ;;  %p132_p4 = scmp.lt.s32.totalorder %s126_s6, %s126_s6 }
  0x2a   :  { %v61_v4 = vmul.f32 0.125, %v52_v3  ;;  %p133_p5 = por %p132_p4, %p131_p3 }
  0x2c   :  { %62 = vst [vmem:[#allocation8] sm:$0xff] %v61_v4  ;;  %p134_p6 = pnand %p133_p5, %p127_p2 }
  0x2e   :  { %137 = shalt.err (!%p134_p6)
}
  0x2f   :  { %s138_s8 = scalar_lea.hbm %s210_s2, 128 }
  0x30   :  { %p139_p7 = scmp.ne.s32.totalorder %s210_s2, %s138_s8  ;;  %p142_p8 = scmp.lt.u32.totalorder %s138_s8, %s210_s2 }
  0x32   :  { %p144_p9 = pnand %p142_p8, %p139_p7 }
  0x34   :  { %147 = shalt.err (!%p144_p9)
}
  0x35   :  { %72 = dma.vmem_to_hbm [thread:$0]  %s70_s5, 128, %s210_s2, [#allocation5]  }
  0x36   :  { %152 = dma.done.wait [#allocation5], 128  }
  0x37   :  { %153 = vsyncadd [#allocation5], 4294967168 }
  0x38   :  { %76 = vsyncpa [#allocation4], 1 }
  0x39   :  { %77 = vsyncpa [#allocation7], 1 }
  0x3a   :  { %78 = vsyncpa [#allocation5], 1 }

</bundles_post_ra>
